<compile_context>
chip_gen: v7x
topology: tpu7x:2x2x1
jax: 0.10.0
libtpu: 0.0.40
codegen_flags: <defaults>
</compile_context>

<pallas_src>
import jax
import jax.numpy as jnp
from jax.experimental import pallas as pl
from jax.experimental.pallas import tpu as pltpu


def _round_up(n, m):
    return ((n + m - 1) // m) * m


# ---------------------------------------------------------------------------
# Kernel: full VAE forward for one batch tile (weights resident in VMEM)
# ---------------------------------------------------------------------------
def _vae_kernel(
    x_ref, eps_ref,
    w1_ref, b1_ref, w2_ref, b2_ref, w3_ref, b3_ref,
    w4_ref, b4_ref, w5_ref, b5_ref, w6_ref, b6_ref,
    recon_ref, ml_ref,
):
    f32 = jnp.float32
    bf16 = jnp.bfloat16
    latent = eps_ref.shape[-1]

    # ---- Encoder ----
    x = x_ref[...].astype(bf16)
    h1 = jnp.dot(x, w1_ref[...], preferred_element_type=f32) + b1_ref[...]
    h1 = jnp.maximum(h1, 0.0)                                    # ReLU (f32 VPU)
    h2 = jnp.dot(h1.astype(bf16), w2_ref[...], preferred_element_type=f32) + b2_ref[...]
    h2 = jnp.maximum(h2, 0.0)                                    # ReLU

    # Single head matmul; torch.chunk(mu_logvar, 2, -1) is just a column split.
    ml = jnp.dot(h2.astype(bf16), w3_ref[...], preferred_element_type=f32) + b3_ref[...]
    mu = ml[:, :latent]
    logvar = ml[:, latent:]

    # ---- Reparameterize: z = mu + eps * exp(0.5 * logvar) ----
    std = jnp.exp(0.5 * logvar)
    z = mu + eps_ref[...] * std

    # ---- Decoder ----
    d1 = jnp.dot(z.astype(bf16), w4_ref[...], preferred_element_type=f32) + b4_ref[...]
    d1 = jnp.maximum(d1, 0.0)                                    # ReLU
    d2 = jnp.dot(d1.astype(bf16), w5_ref[...], preferred_element_type=f32) + b5_ref[...]
    d2 = jnp.maximum(d2, 0.0)                                    # ReLU
    logits = jnp.dot(d2.astype(bf16), w6_ref[...], preferred_element_type=f32) + b6_ref[...]

    # Sigmoid via EUP exp + approximate reciprocal (keeps the divide off the VALU).
    recon = pl.reciprocal(1.0 + jnp.exp(-logits), approx=True)

    recon_ref[...] = recon
    ml_ref[...] = ml          # [TM, 2*latent]; mu/logvar split in the wrapper


# ---------------------------------------------------------------------------
# Wrapper
# ---------------------------------------------------------------------------
def vae_forward(x, eps, params, *, block_rows=512):
    """x: [B, input_dim] f32, eps: [B, latent_dim] f32 -> (recon, mu, logvar)."""
    B, input_dim = x.shape
    latent_dim = eps.shape[-1]
    (w1, b1, w2, b2, w3, b3, w4, b4, w5, b5, w6, b6) = params
    weights = (w1, b1, w2, b2, w3, b3, w4, b4, w5, b5, w6, b6)

    # Batch tile: 512 rows for large batches (MXU-filling, multiple of 256/128);
    # small batches run as a single tile rounded up to the (8, lane) constraint.
    # (512-row tiles keep per-step VMEM at a few MB -> safe even on v7x's 64 MiB.)
    tm = block_rows if B >= block_rows else _round_up(B, 8)
    b_pad = _round_up(B, tm)
    if b_pad != B:
        x = jnp.pad(x, ((0, b_pad - B), (0, 0)))
        eps = jnp.pad(eps, ((0, b_pad - B), (0, 0)))
    grid = (b_pad // tm,)

    rows = lambda i: (i, 0)     # activation tiles march over the batch
    whole = lambda i: (0, 0)    # weights/biases stay resident across steps

    in_specs = [
        pl.BlockSpec((tm, input_dim), rows),
        pl.BlockSpec((tm, latent_dim), rows),
    ] + [pl.BlockSpec(w.shape, whole) for w in weights]

    out_specs = (
        pl.BlockSpec((tm, input_dim), rows),
        pl.BlockSpec((tm, 2 * latent_dim), rows),
    )
    out_shapes = (
        jax.ShapeDtypeStruct((b_pad, input_dim), jnp.float32),       # reconstruction
        jax.ShapeDtypeStruct((b_pad, 2 * latent_dim), jnp.float32),  # [mu | logvar]
    )

    # Advisory cost estimate for the XLA scheduler.
    flops = 2 * b_pad * (input_dim * 512 + 512 * 256 + 256 * 2 * latent_dim
                         + latent_dim * 256 + 256 * 512 + 512 * input_dim)
    transcendentals = b_pad * (latent_dim + input_dim)
    bytes_accessed = (
        sum(int(w.size) * w.dtype.itemsize for w in weights)
        + b_pad * 4 * (2 * input_dim + 3 * latent_dim)
    )

    recon, ml = pl.pallas_call(
        _vae_kernel,
        out_shape=out_shapes,
        grid=grid,
        in_specs=in_specs,
        out_specs=out_specs,
        compiler_params=pltpu.CompilerParams(
            dimension_semantics=("parallel",)),
        cost_estimate=pl.CostEstimate(
            flops=flops,
            transcendentals=transcendentals,
            bytes_accessed=bytes_accessed),
    )(x, eps, *weights)

    recon = recon[:B]
    mu = ml[:B, :latent_dim]
    logvar = ml[:B, latent_dim:]
    return recon, mu, logvar


# ---------------------------------------------------------------------------
# Deterministic parameter construction (PyTorch nn.Linear-style uniform init).
# Weights stored [in, out] in bf16 (MXU operands); biases kept f32.
# ---------------------------------------------------------------------------
def _linear_params(key, fan_in, fan_out):
    kw, kb = jax.random.split(key)
    bound = 1.0 / float(fan_in) ** 0.5
    w = jax.random.uniform(kw, (fan_in, fan_out), jnp.float32, -bound, bound)
    b = jax.random.uniform(kb, (1, fan_out), jnp.float32, -bound, bound)
    return w.astype(jnp.bfloat16), b


def make_vae_params(key, input_dim, latent_dim):
    ks = jax.random.split(key, 6)
    w1, b1 = _linear_params(ks[0], input_dim, 512)
    w2, b2 = _linear_params(ks[1], 512, 256)
    w3, b3 = _linear_params(ks[2], 256, latent_dim * 2)
    w4, b4 = _linear_params(ks[3], latent_dim, 256)
    w5, b5 = _linear_params(ks[4], 256, 512)
    w6, b6 = _linear_params(ks[5], 512, input_dim)
    return (w1, b1, w2, b2, w3, b3, w4, b4, w5, b5, w6, b6)


# ---------------------------------------------------------------------------
# Pure-JAX f32 reference (same bf16 weights, cast up) for sanity checking
# ---------------------------------------------------------------------------
def vae_forward_ref(x, eps, params, latent_dim):
    (w1, b1, w2, b2, w3, b3, w4, b4, w5, b5, w6, b6) = params
    up = lambda a: a.astype(jnp.float32)
    h = jnp.maximum(x @ up(w1) + b1, 0.0)
    h = jnp.maximum(h @ up(w2) + b2, 0.0)
    ml = h @ up(w3) + b3
    mu, logvar = ml[:, :latent_dim], ml[:, latent_dim:]
    z = mu + eps * jnp.exp(0.5 * logvar)
    d = jnp.maximum(z @ up(w4) + b4, 0.0)
    d = jnp.maximum(d @ up(w5) + b5, 0.0)
    recon = jax.nn.sigmoid(d @ up(w6) + b6)
    return recon, mu, logvar


if __name__ == "__main__":
    INPUT_DIM = 64
    LATENT_DIM = 16
    BATCH = 8

    root = jax.random.PRNGKey(0)
    k_params, k_x, k_eps = jax.random.split(root, 3)

    params = make_vae_params(k_params, INPUT_DIM, LATENT_DIM)
    x = jax.random.uniform(k_x, (BATCH, INPUT_DIM), jnp.float32)
    # eps corresponds to torch.randn_like(std) in reparameterize(); generated
    # deterministically here and fed into the kernel.
    eps = jax.random.normal(k_eps, (BATCH, LATENT_DIM), jnp.float32)

    recon, mu, logvar = jax.block_until_ready(vae_forward(x, eps, params))

    # Sanity check against the f32 reference (tolerance accounts for bf16
    # matmul operands and the approximate reciprocal in the sigmoid).
    r_ref, mu_ref, lv_ref = vae_forward_ref(x, eps, params, LATENT_DIM)
    assert recon.shape == (BATCH, INPUT_DIM)
    assert mu.shape == (BATCH, LATENT_DIM) and logvar.shape == (BATCH, LATENT_DIM)
    assert jnp.allclose(recon, r_ref, atol=5e-2), "recon mismatch"
    assert jnp.allclose(mu, mu_ref, atol=5e-2), "mu mismatch"
    assert jnp.allclose(logvar, lv_ref, atol=5e-2), "logvar mismatch"

    print("KERNEL_OK")
</pallas_src>

<mosaic_0001>
module attributes {stable_mosaic.version = 11 : i64} {
  func.func @_vae_kernel(%arg0: i32, %arg1: memref<8x64xf32, #tpu.memory_space<vmem>>, %arg2: memref<8x16xf32, #tpu.memory_space<vmem>>, %arg3: memref<64x512xbf16, #tpu.memory_space<vmem>>, %arg4: memref<1x512xf32, #tpu.memory_space<vmem>>, %arg5: memref<512x256xbf16, #tpu.memory_space<vmem>>, %arg6: memref<1x256xf32, #tpu.memory_space<vmem>>, %arg7: memref<256x32xbf16, #tpu.memory_space<vmem>>, %arg8: memref<1x32xf32, #tpu.memory_space<vmem>>, %arg9: memref<16x256xbf16, #tpu.memory_space<vmem>>, %arg10: memref<1x256xf32, #tpu.memory_space<vmem>>, %arg11: memref<256x512xbf16, #tpu.memory_space<vmem>>, %arg12: memref<1x512xf32, #tpu.memory_space<vmem>>, %arg13: memref<512x64xbf16, #tpu.memory_space<vmem>>, %arg14: memref<1x64xf32, #tpu.memory_space<vmem>>, %arg15: memref<8x64xf32, #tpu.memory_space<vmem>>, %arg16: memref<8x32xf32, #tpu.memory_space<vmem>>) attributes {dimension_semantics = [#tpu.dimension_semantics<parallel>], iteration_bounds = array<i64: 1>, scalar_prefetch = 0 : i64, scratch_operands = 0 : i64, tpu.core_type = #tpu.core_type<tc>, window_params = [{transform_indices = @transform_0, window_bounds = array<i64: 8, 64>}, {transform_indices = @transform_1, window_bounds = array<i64: 8, 16>}, {pipeline_mode = #tpu.pipeline_mode<synchronous>, transform_indices = @transform_2, window_bounds = array<i64: 64, 512>}, {pipeline_mode = #tpu.pipeline_mode<synchronous>, transform_indices = @transform_3, window_bounds = array<i64: 1, 512>}, {pipeline_mode = #tpu.pipeline_mode<synchronous>, transform_indices = @transform_4, window_bounds = array<i64: 512, 256>}, {pipeline_mode = #tpu.pipeline_mode<synchronous>, transform_indices = @transform_5, window_bounds = array<i64: 1, 256>}, {pipeline_mode = #tpu.pipeline_mode<synchronous>, transform_indices = @transform_6, window_bounds = array<i64: 256, 32>}, {pipeline_mode = #tpu.pipeline_mode<synchronous>, transform_indices = @transform_7, window_bounds = array<i64: 1, 32>}, {pipeline_mode = #tpu.pipeline_mode<synchronous>, transform_indices = @transform_8, window_bounds = array<i64: 16, 256>}, {pipeline_mode = #tpu.pipeline_mode<synchronous>, transform_indices = @transform_9, window_bounds = array<i64: 1, 256>}, {pipeline_mode = #tpu.pipeline_mode<synchronous>, transform_indices = @transform_10, window_bounds = array<i64: 256, 512>}, {pipeline_mode = #tpu.pipeline_mode<synchronous>, transform_indices = @transform_11, window_bounds = array<i64: 1, 512>}, {pipeline_mode = #tpu.pipeline_mode<synchronous>, transform_indices = @transform_12, window_bounds = array<i64: 512, 64>}, {pipeline_mode = #tpu.pipeline_mode<synchronous>, transform_indices = @transform_13, window_bounds = array<i64: 1, 64>}, {transform_indices = @transform_14, window_bounds = array<i64: 8, 64>}, {transform_indices = @transform_15, window_bounds = array<i64: 8, 32>}]} {
    %c0 = arith.constant 0 : index
    %c0_0 = arith.constant 0 : index
    %0 = vector.load %arg1[%c0, %c0_0] : memref<8x64xf32, #tpu.memory_space<vmem>>, vector<8x64xf32>
    %1 = arith.truncf %0 : vector<8x64xf32> to vector<8x64xbf16>
    %c0_1 = arith.constant 0 : index
    %c0_2 = arith.constant 0 : index
    %2 = vector.load %arg3[%c0_1, %c0_2] : memref<64x512xbf16, #tpu.memory_space<vmem>>, vector<64x512xbf16>
    %cst = arith.constant dense<0.000000e+00> : vector<8x512xf32>
    %3 = tpu.matmul %1, %2, %cst {dimension_numbers = #tpu.dot_dimension_numbers<[1], [0], [0], [1], [0, 0, 1, 1], [], []>} : vector<8x64xbf16>, vector<64x512xbf16>, vector<8x512xf32> -> vector<8x512xf32>
    %c0_3 = arith.constant 0 : index
    %c0_4 = arith.constant 0 : index
    %4 = vector.load %arg4[%c0_3, %c0_4] : memref<1x512xf32, #tpu.memory_space<vmem>>, vector<1x512xf32>
    %5 = vector.broadcast %4 : vector<1x512xf32> to vector<8x512xf32>
    %6 = arith.addf %3, %5 : vector<8x512xf32>
    %cst_5 = arith.constant 0.000000e+00 : f32
    %7 = vector.broadcast %cst_5 : f32 to vector<8x512xf32>
    %8 = arith.maximumf %6, %7 : vector<8x512xf32>
    %9 = arith.truncf %8 : vector<8x512xf32> to vector<8x512xbf16>
    %c0_6 = arith.constant 0 : index
    %c0_7 = arith.constant 0 : index
    %10 = vector.load %arg5[%c0_6, %c0_7] : memref<512x256xbf16, #tpu.memory_space<vmem>>, vector<512x256xbf16>
    %cst_8 = arith.constant dense<0.000000e+00> : vector<8x256xf32>
    %11 = tpu.matmul %9, %10, %cst_8 {dimension_numbers = #tpu.dot_dimension_numbers<[1], [0], [0], [1], [0, 0, 1, 1], [], []>} : vector<8x512xbf16>, vector<512x256xbf16>, vector<8x256xf32> -> vector<8x256xf32>
    %c0_9 = arith.constant 0 : index
    %c0_10 = arith.constant 0 : index
    %12 = vector.load %arg6[%c0_9, %c0_10] : memref<1x256xf32, #tpu.memory_space<vmem>>, vector<1x256xf32>
    %13 = vector.broadcast %12 : vector<1x256xf32> to vector<8x256xf32>
    %14 = arith.addf %11, %13 : vector<8x256xf32>
    %cst_11 = arith.constant 0.000000e+00 : f32
    %15 = vector.broadcast %cst_11 : f32 to vector<8x256xf32>
    %16 = arith.maximumf %14, %15 : vector<8x256xf32>
    %17 = arith.truncf %16 : vector<8x256xf32> to vector<8x256xbf16>
    %c0_12 = arith.constant 0 : index
    %c0_13 = arith.constant 0 : index
    %18 = vector.load %arg7[%c0_12, %c0_13] : memref<256x32xbf16, #tpu.memory_space<vmem>>, vector<256x32xbf16>
    %cst_14 = arith.constant dense<0.000000e+00> : vector<8x32xf32>
    %19 = tpu.matmul %17, %18, %cst_14 {dimension_numbers = #tpu.dot_dimension_numbers<[1], [0], [0], [1], [0, 0, 1, 1], [], []>} : vector<8x256xbf16>, vector<256x32xbf16>, vector<8x32xf32> -> vector<8x32xf32>
    %c0_15 = arith.constant 0 : index
    %c0_16 = arith.constant 0 : index
    %20 = vector.load %arg8[%c0_15, %c0_16] : memref<1x32xf32, #tpu.memory_space<vmem>>, vector<1x32xf32>
    %21 = vector.broadcast %20 : vector<1x32xf32> to vector<8x32xf32>
    %22 = arith.addf %19, %21 : vector<8x32xf32>
    %23 = vector.extract_strided_slice %22 {offsets = [0, 0], sizes = [8, 16], strides = [1, 1]} : vector<8x32xf32> to vector<8x16xf32>
    %24 = vector.extract_strided_slice %22 {offsets = [0, 16], sizes = [8, 16], strides = [1, 1]} : vector<8x32xf32> to vector<8x16xf32>
    %cst_17 = arith.constant 5.000000e-01 : f32
    %25 = vector.broadcast %cst_17 : f32 to vector<8x16xf32>
    %26 = arith.mulf %25, %24 : vector<8x16xf32>
    %27 = math.exp %26 : vector<8x16xf32>
    %c0_18 = arith.constant 0 : index
    %c0_19 = arith.constant 0 : index
    %28 = vector.load %arg2[%c0_18, %c0_19] : memref<8x16xf32, #tpu.memory_space<vmem>>, vector<8x16xf32>
    %29 = arith.mulf %28, %27 : vector<8x16xf32>
    %30 = arith.addf %23, %29 : vector<8x16xf32>
    %31 = arith.truncf %30 : vector<8x16xf32> to vector<8x16xbf16>
    %c0_20 = arith.constant 0 : index
    %c0_21 = arith.constant 0 : index
    %32 = vector.load %arg9[%c0_20, %c0_21] : memref<16x256xbf16, #tpu.memory_space<vmem>>, vector<16x256xbf16>
    %cst_22 = arith.constant dense<0.000000e+00> : vector<8x256xf32>
    %33 = tpu.matmul %31, %32, %cst_22 {dimension_numbers = #tpu.dot_dimension_numbers<[1], [0], [0], [1], [0, 0, 1, 1], [], []>} : vector<8x16xbf16>, vector<16x256xbf16>, vector<8x256xf32> -> vector<8x256xf32>
    %c0_23 = arith.constant 0 : index
    %c0_24 = arith.constant 0 : index
    %34 = vector.load %arg10[%c0_23, %c0_24] : memref<1x256xf32, #tpu.memory_space<vmem>>, vector<1x256xf32>
    %35 = vector.broadcast %34 : vector<1x256xf32> to vector<8x256xf32>
    %36 = arith.addf %33, %35 : vector<8x256xf32>
    %cst_25 = arith.constant 0.000000e+00 : f32
    %37 = vector.broadcast %cst_25 : f32 to vector<8x256xf32>
    %38 = arith.maximumf %36, %37 : vector<8x256xf32>
    %39 = arith.truncf %38 : vector<8x256xf32> to vector<8x256xbf16>
    %c0_26 = arith.constant 0 : index
    %c0_27 = arith.constant 0 : index
    %40 = vector.load %arg11[%c0_26, %c0_27] : memref<256x512xbf16, #tpu.memory_space<vmem>>, vector<256x512xbf16>
    %cst_28 = arith.constant dense<0.000000e+00> : vector<8x512xf32>
    %41 = tpu.matmul %39, %40, %cst_28 {dimension_numbers = #tpu.dot_dimension_numbers<[1], [0], [0], [1], [0, 0, 1, 1], [], []>} : vector<8x256xbf16>, vector<256x512xbf16>, vector<8x512xf32> -> vector<8x512xf32>
    %c0_29 = arith.constant 0 : index
    %c0_30 = arith.constant 0 : index
    %42 = vector.load %arg12[%c0_29, %c0_30] : memref<1x512xf32, #tpu.memory_space<vmem>>, vector<1x512xf32>
    %43 = vector.broadcast %42 : vector<1x512xf32> to vector<8x512xf32>
    %44 = arith.addf %41, %43 : vector<8x512xf32>
    %cst_31 = arith.constant 0.000000e+00 : f32
    %45 = vector.broadcast %cst_31 : f32 to vector<8x512xf32>
    %46 = arith.maximumf %44, %45 : vector<8x512xf32>
    %47 = arith.truncf %46 : vector<8x512xf32> to vector<8x512xbf16>
    %c0_32 = arith.constant 0 : index
    %c0_33 = arith.constant 0 : index
    %48 = vector.load %arg13[%c0_32, %c0_33] : memref<512x64xbf16, #tpu.memory_space<vmem>>, vector<512x64xbf16>
    %cst_34 = arith.constant dense<0.000000e+00> : vector<8x64xf32>
    %49 = tpu.matmul %47, %48, %cst_34 {dimension_numbers = #tpu.dot_dimension_numbers<[1], [0], [0], [1], [0, 0, 1, 1], [], []>} : vector<8x512xbf16>, vector<512x64xbf16>, vector<8x64xf32> -> vector<8x64xf32>
    %c0_35 = arith.constant 0 : index
    %c0_36 = arith.constant 0 : index
    %50 = vector.load %arg14[%c0_35, %c0_36] : memref<1x64xf32, #tpu.memory_space<vmem>>, vector<1x64xf32>
    %51 = vector.broadcast %50 : vector<1x64xf32> to vector<8x64xf32>
    %52 = arith.addf %49, %51 : vector<8x64xf32>
    %cst_37 = arith.constant 0.000000e+00 : f32
    %53 = vector.broadcast %cst_37 : f32 to vector<8x64xf32>
    %54 = arith.subf %53, %52 : vector<8x64xf32>
    %55 = math.exp %54 : vector<8x64xf32>
    %cst_38 = arith.constant 1.000000e+00 : f32
    %56 = vector.broadcast %cst_38 : f32 to vector<8x64xf32>
    %57 = arith.addf %56, %55 : vector<8x64xf32>
    %58 = tpu.reciprocal %57 {approx = true} : vector<8x64xf32> -> vector<8x64xf32>
    %c0_39 = arith.constant 0 : index
    %c0_40 = arith.constant 0 : index
    %59 = vector.load %arg15[%c0_39, %c0_40] : memref<8x64xf32, #tpu.memory_space<vmem>>, vector<8x64xf32>
    tpu.vector_store %arg15[%c0_39, %c0_40], %58 {strides = array<i32>} : memref<8x64xf32, #tpu.memory_space<vmem>>, vector<8x64xf32>,
    %c0_41 = arith.constant 0 : index
    %c0_42 = arith.constant 0 : index
    %60 = vector.load %arg16[%c0_41, %c0_42] : memref<8x32xf32, #tpu.memory_space<vmem>>, vector<8x32xf32>
    tpu.vector_store %arg16[%c0_41, %c0_42], %22 {strides = array<i32>} : memref<8x32xf32, #tpu.memory_space<vmem>>, vector<8x32xf32>,
    return
  }
  func.func @transform_0(%arg0: i32) -> (i32, i32) {
    %c0_i32 = arith.constant 0 : i32
    %c0_i32_0 = arith.constant 0 : i32
    return %arg0, %c0_i32 : i32, i32
  }
  func.func @transform_1(%arg0: i32) -> (i32, i32) {
    %c0_i32 = arith.constant 0 : i32
    %c0_i32_0 = arith.constant 0 : i32
    return %arg0, %c0_i32 : i32, i32
  }
  func.func @transform_2(%arg0: i32) -> (i32, i32) {
    %c0_i32 = arith.constant 0 : i32
    %c0_i32_0 = arith.constant 0 : i32
    %c0_i32_1 = arith.constant 0 : i32
    return %c0_i32, %c0_i32_0 : i32, i32
  }
  func.func @transform_3(%arg0: i32) -> (i32, i32) {
    %c0_i32 = arith.constant 0 : i32
    %c0_i32_0 = arith.constant 0 : i32
    %c0_i32_1 = arith.constant 0 : i32
    return %c0_i32, %c0_i32_0 : i32, i32
  }
  func.func @transform_4(%arg0: i32) -> (i32, i32) {
    %c0_i32 = arith.constant 0 : i32
    %c0_i32_0 = arith.constant 0 : i32
    %c0_i32_1 = arith.constant 0 : i32
    return %c0_i32, %c0_i32_0 : i32, i32
  }
  func.func @transform_5(%arg0: i32) -> (i32, i32) {
    %c0_i32 = arith.constant 0 : i32
    %c0_i32_0 = arith.constant 0 : i32
    %c0_i32_1 = arith.constant 0 : i32
    return %c0_i32, %c0_i32_0 : i32, i32
  }
  func.func @transform_6(%arg0: i32) -> (i32, i32) {
    %c0_i32 = arith.constant 0 : i32
    %c0_i32_0 = arith.constant 0 : i32
    %c0_i32_1 = arith.constant 0 : i32
    return %c0_i32, %c0_i32_0 : i32, i32
  }
  func.func @transform_7(%arg0: i32) -> (i32, i32) {
    %c0_i32 = arith.constant 0 : i32
    %c0_i32_0 = arith.constant 0 : i32
    %c0_i32_1 = arith.constant 0 : i32
    return %c0_i32, %c0_i32_0 : i32, i32
  }
  func.func @transform_8(%arg0: i32) -> (i32, i32) {
    %c0_i32 = arith.constant 0 : i32
    %c0_i32_0 = arith.constant 0 : i32
    %c0_i32_1 = arith.constant 0 : i32
    return %c0_i32, %c0_i32_0 : i32, i32
  }
  func.func @transform_9(%arg0: i32) -> (i32, i32) {
    %c0_i32 = arith.constant 0 : i32
    %c0_i32_0 = arith.constant 0 : i32
    %c0_i32_1 = arith.constant 0 : i32
    return %c0_i32, %c0_i32_0 : i32, i32
  }
  func.func @transform_10(%arg0: i32) -> (i32, i32) {
    %c0_i32 = arith.constant 0 : i32
    %c0_i32_0 = arith.constant 0 : i32
    %c0_i32_1 = arith.constant 0 : i32
    return %c0_i32, %c0_i32_0 : i32, i32
  }
  func.func @transform_11(%arg0: i32) -> (i32, i32) {
    %c0_i32 = arith.constant 0 : i32
    %c0_i32_0 = arith.constant 0 : i32
    %c0_i32_1 = arith.constant 0 : i32
    return %c0_i32, %c0_i32_0 : i32, i32
  }
  func.func @transform_12(%arg0: i32) -> (i32, i32) {
    %c0_i32 = arith.constant 0 : i32
    %c0_i32_0 = arith.constant 0 : i32
    %c0_i32_1 = arith.constant 0 : i32
    return %c0_i32, %c0_i32_0 : i32, i32
  }
  func.func @transform_13(%arg0: i32) -> (i32, i32) {
    %c0_i32 = arith.constant 0 : i32
    %c0_i32_0 = arith.constant 0 : i32
    %c0_i32_1 = arith.constant 0 : i32
    return %c0_i32, %c0_i32_0 : i32, i32
  }
  func.func @transform_14(%arg0: i32) -> (i32, i32) {
    %c0_i32 = arith.constant 0 : i32
    %c0_i32_0 = arith.constant 0 : i32
    return %arg0, %c0_i32 : i32, i32
  }
  func.func @transform_15(%arg0: i32) -> (i32, i32) {
    %c0_i32 = arith.constant 0 : i32
    %c0_i32_0 = arith.constant 0 : i32
    return %arg0, %c0_i32 : i32, i32
  }
}

</mosaic_0001>

<bundles_post_ra>
// kernel: tpu_custom_call.1
= control target key start
LH: loop header
LB: loop body
LE: loop exit
PB: predicated region body
PF: predicated region fallthrough
CT: control target
= control target key end

     0   :  { %21 = vsyncpa [#allocation3], 0  ;;  %s3104_s0 = inlined_call_operand.vmem [shape: f32[8,64], index: 0, kind: input, shape index: {}]   ;;  %s3105_s1 = inlined_call_operand.vmem [shape: f32[8,16], index: 1, kind: input, shape index: {}]   ;;  %s3106_s2 = inlined_call_operand.hbm [shape: bf16[64,512], index: 2, kind: input, shape index: {}]   ;;  %s3107_s3 = inlined_call_operand.vmem [shape: f32[1,512], index: 3, kind: input, shape index: {}]   ;;  %s3108_s4 = inlined_call_operand.vmem [shape: bf16[512,256], index: 4, kind: input, shape index: {}]   ;;  %s3109_s5 = inlined_call_operand.vmem [shape: f32[1,256], index: 5, kind: input, shape index: {}]   ;;  %s3110_s6 = inlined_call_operand.vmem [shape: bf16[256,32], index: 6, kind: input, shape index: {}]   ;;  %s3111_s7 = inlined_call_operand.vmem [shape: f32[1,32], index: 7, kind: input, shape index: {}]   ;;  %s3112_s8 = inlined_call_operand.vmem [shape: bf16[16,256], index: 8, kind: input, shape index: {}]   ;;  %s3113_s9 = inlined_call_operand.vmem [shape: f32[1,256], index: 9, kind: input, shape index: {}]   ;;  %s3114_s10 = inlined_call_operand.hbm [shape: bf16[256,512], index: 10, kind: input, shape index: {}]   ;;  %s3115_s11 = inlined_call_operand.vmem [shape: f32[1,512], index: 11, kind: input, shape index: {}]   ;;  %s3116_s12 = inlined_call_operand.vmem [shape: bf16[512,64], index: 12, kind: input, shape index: {}]   ;;  %s3117_s13 = inlined_call_operand.vmem [shape: f32[1,64], index: 13, kind: input, shape index: {}]   ;;  %s3118_s14 = inlined_call_operand.hbm [shape: f32[8,64], index: 14, kind: output, shape index: {0}]   ;;  %s3119_s15 = inlined_call_operand.hbm [shape: f32[8,32], index: 15, kind: output, shape index: {1}]  }
   0x1   :  { %22 = vsyncpa [#allocation6], 0 }
   0x2   :  { %23 = vsyncpa [#allocation4], 0 }
   0x3   :  { %24 = vsyncpa [#allocation9], 0  ;;  %s2560_s18 = smov [#allocation2]   ;;  %s2464_s22 = scalar_lea.hbm %s3106_s2, 2048 }
   0x4   :  { %s34_s19 = sshll.u32 %s2560_s18, 4  ;;  %p2465_p0 = scmp.ne.s32.totalorder %s3106_s2, %s2464_s22  ;;  %s35_s19 = int_to_ptr.vmem [resolvable:$true] %s34_s19 }
   0x5   :  { %p2468_p1 = scmp.lt.u32.totalorder %s2464_s22, %s3106_s2 }
   0x7   :  { %p2470_p2 = pnand %p2468_p1, %p2465_p0 }
   0x9   :  { %2473 = shalt.err (!%p2470_p2)
}
   0xa   :  { %s2474_s27 = scalar_lea.vmem %s35_s19, 2048  ;;  %p2479_p4 = scmp.lt.s32.totalorder %s35_s19, %s35_s19 }
   0xb   :  { %p2475_p3 = scmp.ne.s32.totalorder %s35_s19, %s2474_s27  ;;  %p2480_p5 = scmp.lt.s32.totalorder %s2474_s27, %s2474_s27 }
   0xd   :  { %p2481_p6 = por %p2480_p5, %p2479_p4 }
   0xf   :  { %p2482_p7 = pnand %p2481_p6, %p2475_p3 }
  0x11   :  { %2485 = shalt.err (!%p2482_p7)
}
  0x12   :  { %s2561_s28 = smov 256   ;;  %s2562_s29 = smov 16  }
  0x13   :  { %40 = dma.hbm_to_vmem [thread:$0]  %s3106_s2, 2048, %s35_s19, [#allocation3], %s2561_s28, %s2561_s28, %s2562_s29  }
  0x14   :  { %s2563_s17 = smov [#allocation5]   ;;  %s2486_s22 = scalar_lea.hbm %s3114_s10, 8192 }
  0x15   :  { %s60_s18 = sshll.u32 %s2563_s17, 4  ;;  %p2487_p8 = scmp.ne.s32.totalorder %s3114_s10, %s2486_s22  ;;  %s61_s18 = int_to_ptr.vmem [resolvable:$true] %s60_s18 }
  0x16   :  { %p2490_p9 = scmp.lt.u32.totalorder %s2486_s22, %s3114_s10 }
  0x18   :  { %p2492_p10 = pnand %p2490_p9, %p2487_p8 }
  0x1a   :  { %2495 = shalt.err (!%p2492_p10)
}
  0x1b   :  { %s2496_s27 = scalar_lea.vmem %s61_s18, 8192  ;;  %p2501_p12 = scmp.lt.s32.totalorder %s61_s18, %s61_s18 }
  0x1c   :  { %p2497_p11 = scmp.ne.s32.totalorder %s61_s18, %s2496_s27  ;;  %p2502_p13 = scmp.lt.s32.totalorder %s2496_s27, %s2496_s27 }
  0x1e   :  { %p2503_p0 = por %p2502_p13, %p2501_p12 }
  0x20   :  { %p2504_p1 = pnand %p2503_p0, %p2497_p11 }
  0x22   :  { %2507 = shalt.err (!%p2504_p1)
}
  0x23   :  { %66 = dma.hbm_to_vmem [thread:$0]  %s3114_s10, 8192, %s61_s18, [#allocation6], %s2561_s28, %s2561_s28, %s2562_s29  }
  0x24   :  { %2552 = dma.done.wait [#allocation3], 2048  }
  0x25   :  { %2553 = vsyncadd [#allocation3], 4294965248 }
  0x26   :  { %2554 = dma.done.wait [#allocation6], 8192  }
  0x27   :  { %2555 = vsyncadd [#allocation6], 4294959104  ;;  %v2564_v0 = vmov 0   ;;  %v2191_v1 = vld [vmem:[#allocation2 + $0x4] ss:$16 sps:$4 sm:$0xff]   ;;  %vm200_vm0 = vcmask 523264  }
  0x28   :  { %236 = vmatprep.mubr.bf16.mxu1 %v2564_v0  ;;  %v2193_v2 = vld [vmem:[#allocation2] ss:$16 sps:$4 sm:$0xff]   ;;  %204 = vmatprep.subr.bf16.mxu1 %v2191_v1  ;;  %v2194_v3 = vld [vmem:[#allocation2 + $0x24] ss:$16 sps:$4 sm:$0xff]   ;;  %v2205_v10 = vld [vmem:[#allocation2 + $0xc] ss:$16 sps:$4 sm:$0xff]   ;;  %v100_v1 = vlaneseq }
  0x29   :  { %205 = vmatpush1.bf16.msra.mxu1 %v2193_v2  ;;  %v2196_v4 = vld [vmem:[#allocation2 + $0x20] ss:$16 sps:$4 sm:$0xff]   ;;  %v2197_v5 = vld [vmem:[#allocation2 + $0x44] ss:$16 sps:$4 sm:$0xff]   ;;  %v2203_v15 = vld [vmem:[#allocation2 + $0x8] ss:$16 sps:$4 sm:$0xff]  }
  0x2a   :  { %206 = vmatprep.subr.bf16.mxu1 %v2194_v3  ;;  %v2199_v6 = vld [vmem:[#allocation2 + $0x40] ss:$16 sps:$4 sm:$0xff]   ;;  %v2200_v7 = vld [vmem:[#allocation2 + $0x64] ss:$16 sps:$4 sm:$0xff]   ;;  %v2208_v17 = vld [vmem:[#allocation2 + $0x2c] ss:$16 sps:$4 sm:$0xff]  }
  0x2b   :  { %v2202_v8 = vld [vmem:[#allocation2 + $0x60] ss:$16 sps:$4 sm:$0xff]   ;;  %v2215_v11 = vld [vmem:[%s3108_s4 + $0x4] ss:$8 sps:$4 sm:$0xff]   ;;  %v2218_v13 = vld [vmem:[%s3108_s4 + $0x14] ss:$8 sps:$4 sm:$0xff]  }
  0x2c   :  { %v80_v9 = vld [vmem:[%s3104_s0] sm:$0xff]  ;;  %690 = vmatprep.subr.bf16.mxu0 %v2215_v11  ;;  %v2220_v16 = vld [vmem:[%s3108_s4 + $0x10] ss:$8 sps:$4 sm:$0xff]   ;;  %v2224_v21 = vld [vmem:[%s3108_s4 + $0x34] ss:$8 sps:$4 sm:$0xff]   ;;  %v2814_v2 = vshrl.u32 %v100_v1, 7 }
  0x2d   :  { %207 = vmatpush1.bf16.msra.mxu1 %v2196_v4  ;;  %v2217_v12 = vld [vmem:[%s3108_s4] ss:$8 sps:$4 sm:$0xff]   ;;  %v81_v14 = vpack.c.bf16 %v80_v9, %v80_v9  ;;  %v2221_v18 = vld [vmem:[%s3108_s4 + $0x24] ss:$8 sps:$4 sm:$0xff]   ;;  %v2226_v24 = vld [vmem:[%s3108_s4 + $0x30] ss:$8 sps:$4 sm:$0xff]  }
  0x2e   :  { %208 = vmatprep.subr.bf16.mxu1 %v2197_v5  ;;  %691 = vmatpush1.bf16.msra.mxu0 %v2217_v12  ;;  %v2206_v19 = vld [vmem:[#allocation2 + $0x28] ss:$16 sps:$4 sm:$0xff]   ;;  %v2211_v22 = vld [vmem:[#allocation2 + $0x4c] ss:$16 sps:$4 sm:$0xff]   ;;  %v2311_v52 = vld [vmem:[%s3110_s6 + $0x40] sm:$0xff]   ;;  %v2817_v3 = vsub.s32 0, %v2814_v2 }
  0x2f   :  { %692 = vmatprep.subr.bf16.mxu0 %v2218_v13  ;;  %v2223_v20 = vld [vmem:[%s3108_s4 + $0x20] ss:$8 sps:$4 sm:$0xff]   ;;  %v2227_v25 = vld [vmem:[%s3108_s4 + $0x44] ss:$8 sps:$4 sm:$0xff]   ;;  %v2230_v29 = vld [vmem:[%s3108_s4 + $0x54] ss:$8 sps:$4 sm:$0xff]  }
  0x30   :  { %v2209_v23 = vld [vmem:[#allocation2 + $0x48] ss:$16 sps:$4 sm:$0xff]   ;;  %v2214_v26 = vld [vmem:[#allocation2 + $0x6c] ss:$16 sps:$4 sm:$0xff]   ;;  %v2312_v53 = vld [vmem:[%s3110_s6] sm:$0xff]   ;;  %v2825_v5 = vsub.s32 1, %v2814_v2 }
  0x31   :  { %209 = vmatpush1.bf16.msra.mxu1 %v2199_v6  ;;  %v2212_v27 = vld [vmem:[#allocation2 + $0x68] ss:$16 sps:$4 sm:$0xff]   ;;  %v2233_v31 = vld [vmem:[%s3108_s4 + $0x64] ss:$8 sps:$4 sm:$0xff]   ;;  %v2236_v33 = vld [vmem:[%s3108_s4 + $0x74] ss:$8 sps:$4 sm:$0xff]  }
  0x32   :  { %210 = vmatprep.subr.bf16.mxu1 %v2200_v7  ;;  %693 = vmatpush1.bf16.msra.mxu0 %v2220_v16  ;;  %v2229_v28 = vld [vmem:[%s3108_s4 + $0x40] ss:$8 sps:$4 sm:$0xff]   ;;  %v2232_v30 = vld [vmem:[%s3108_s4 + $0x50] ss:$8 sps:$4 sm:$0xff]   ;;  %v2239_v35 = vld [vmem:[%s3108_s4 + $0x84] ss:$8 sps:$4 sm:$0xff]  }
  0x33   :  { %694 = vmatprep.subr.bf16.mxu0 %v2221_v18  ;;  %v2235_v32 = vld [vmem:[%s3108_s4 + $0x60] ss:$8 sps:$4 sm:$0xff]   ;;  %v2238_v34 = vld [vmem:[%s3108_s4 + $0x70] ss:$8 sps:$4 sm:$0xff]   ;;  %v2242_v37 = vld [vmem:[%s3108_s4 + $0x94] ss:$8 sps:$4 sm:$0xff]  }
  0x34   :  { %v2241_v36 = vld [vmem:[%s3108_s4 + $0x80] ss:$8 sps:$4 sm:$0xff]   ;;  %v2244_v38 = vld [vmem:[%s3108_s4 + $0x90] ss:$8 sps:$4 sm:$0xff]   ;;  %v2245_v39 = vld [vmem:[%s3108_s4 + $0xa4] ss:$8 sps:$4 sm:$0xff]  }
  0x35   :  { %211 = vmatpush1.bf16.msra.mxu1 %v2202_v8  ;;  %v2247_v40 = vld [vmem:[%s3108_s4 + $0xa0] ss:$8 sps:$4 sm:$0xff]   ;;  %v2248_v41 = vld [vmem:[%s3108_s4 + $0xb4] ss:$8 sps:$4 sm:$0xff]   ;;  %v2250_v42 = vld [vmem:[%s3108_s4 + $0xb0] ss:$8 sps:$4 sm:$0xff]  }
  0x36   :  { %245 = vmatprep.subr.bf16.mxu1 %v2205_v10  ;;  %695 = vmatpush1.bf16.msra.mxu0 %v2223_v20  ;;  %v2251_v43 = vld [vmem:[%s3108_s4 + $0xc4] ss:$8 sps:$4 sm:$0xff]   ;;  %v2253_v44 = vld [vmem:[%s3108_s4 + $0xc0] ss:$8 sps:$4 sm:$0xff]   ;;  %v2254_v45 = vld [vmem:[%s3108_s4 + $0xd4] ss:$8 sps:$4 sm:$0xff]  }
  0x37   :  { %696 = vmatprep.subr.bf16.mxu0 %v2224_v21  ;;  %v2256_v46 = vld [vmem:[%s3108_s4 + $0xd0] ss:$8 sps:$4 sm:$0xff]   ;;  %v2257_v47 = vld [vmem:[%s3108_s4 + $0xe4] ss:$8 sps:$4 sm:$0xff]   ;;  %v2259_v48 = vld [vmem:[%s3108_s4 + $0xe0] ss:$8 sps:$4 sm:$0xff]  }
  0x38   :  { %1928 = vmatmul.mubr.msk.bf16.vlgmr.msra.gmra.mrb[0].mxu1 %vm200_vm0, %v81_v14  ;;  %v2260_v49 = vld [vmem:[%s3108_s4 + $0xf4] ss:$8 sps:$4 sm:$0xff]   ;;  %v2262_v50 = vld [vmem:[%s3108_s4 + $0xf0] ss:$8 sps:$4 sm:$0xff]   ;;  %v2265_v51 = vld [vmem:[%s3108_s4 + $0x104] ss:$8 sps:$4 sm:$0xff]  }
  0x39   :  { %246 = vmatpush1.bf16.msra.mxu1 %v2203_v15  ;;  %277 = vmatprep.mubr.bf16.mxu1 %v2564_v0  ;;  %v2313_v54 = vld [vmem:[%s3110_s6 + $0x48] sm:$0xff]   ;;  %v2315_v56 = vld [vmem:[%s3110_s6 + $0x50] sm:$0xff]   ;;  %v2317_v58 = vld [vmem:[%s3110_s6 + $0x58] sm:$0xff]   ;;  %v114_v21 = vsub.s32 3, %v2814_v2  ;;  %vm1880_vm1 = vcmask 261120   ;;  %vm986_vm2 = vcmask 130048  }
  0x3a   :  { %247 = vmatprep.subr.bf16.mxu1 %v2208_v17  ;;  %697 = vmatpush1.bf16.msra.mxu0 %v2226_v24  ;;  %v2314_v55 = vld [vmem:[%s3110_s6 + $0x8] sm:$0xff]   ;;  %v2316_v57 = vld [vmem:[%s3110_s6 + $0x10] sm:$0xff]   ;;  %v2318_v59 = vld [vmem:[%s3110_s6 + $0x18] sm:$0xff]  }
  0x3b   :  { %698 = vmatprep.subr.bf16.mxu0 %v2227_v25  ;;  %v2319_v60 = vld [vmem:[%s3110_s6 + $0x60] sm:$0xff]   ;;  %v2321_v62 = vld [vmem:[%s3110_s6 + $0x68] sm:$0xff]   ;;  %v2266_v20 = vld [vmem:[%s3108_s4 + $0x110] ss:$8 sps:$4 sm:$0xff]  }
  0x3c   :  { %v2320_v61 = vld [vmem:[%s3110_s6 + $0x20] sm:$0xff]   ;;  %v2322_v63 = vld [vmem:[%s3110_s6 + $0x28] sm:$0xff]   ;;  %v2274_v25 = vld [vmem:[%s3108_s4 + $0x134] ss:$8 sps:$4 sm:$0xff]  }
  0x3d   :  { %248 = vmatpush1.bf16.msra.mxu1 %v2206_v19  ;;  %v2822_v4 = vld [vmem:[%s3107_s3] sm:$0xf]  ;;  %v2268_v19 = vld [vmem:[%s3108_s4 + $0x114] ss:$8 sps:$4 sm:$0xff]  }
  0x3e   :  { %249 = vmatprep.subr.bf16.mxu1 %v2211_v22  ;;  %699 = vmatpush1.bf16.msra.mxu0 %v2229_v28  ;;  %v103_v6 = vrot.slane %v2822_v4, %v2817_v3  ;;  %v107_v7 = vrot.slane %v2822_v4, %v2825_v5  ;;  %v2263_v17 = vld [vmem:[%s3108_s4 + $0x100] ss:$8 sps:$4 sm:$0xff]   ;;  %v2271_v22 = vld [vmem:[%s3108_s4 + $0x124] ss:$8 sps:$4 sm:$0xff]   ;;  %v115_v24 = vrot.slane %v2822_v4, %v114_v21  ;;  %v2272_v28 = vld [vmem:[%s3108_s4 + $0x130] ss:$8 sps:$4 sm:$0xff]  }
  0x3f   :  { %700 = vmatprep.subr.bf16.mxu0 %v2230_v29  ;;  %v2324_v1 = vld [vmem:[%s3110_s6 + $0x30] sm:$0xff]  }
  0x41   :  { %250 = vmatpush1.bf16.msra.mxu1 %v2209_v23  ;;  %v2269_v23 = vld [vmem:[%s3108_s4 + $0x120] ss:$8 sps:$4 sm:$0xff]  }
  0x42   :  { %251 = vmatprep.subr.bf16.mxu1 %v2214_v26  ;;  %701 = vmatpush1.bf16.msra.mxu0 %v2232_v30 }
  0x43   :  { %702 = vmatprep.subr.bf16.mxu0 %v2233_v31  ;;  %v2277_v31 = vld [vmem:[%s3108_s4 + $0x144] ss:$8 sps:$4 sm:$0xff]  }
  0x45   :  { %252 = vmatpush1.bf16.msra.mxu1 %v2212_v27 }
  0x46   :  { %703 = vmatpush1.bf16.msra.mxu0 %v2235_v32  ;;  %2111 = vmatprep.subr.bf16.mxu1 %v2311_v52  ;;  %v110_v52 = vsub.s32 2, %v2814_v2 }
  0x47   :  { %704 = vmatprep.subr.bf16.mxu0 %v2236_v33 }
  0x48   :  { %1929 = vmatmul.mubr.msk.bf16.vlgmr.msra.gmra.mrb[4].mxu1 %vm200_vm0, %v81_v14 }
  0x49   :  { %2112 = vmatpush3.bf16.msra.mxu1 %v2312_v53  ;;  %v2304_v53 = vld [vmem:[%s3108_s4 + $0x1d4] ss:$8 sps:$4 sm:$0xff]  }
  0x4a   :  { %705 = vmatpush1.bf16.msra.mxu0 %v2238_v34  ;;  %2113 = vmatprep.subr.bf16.mxu1 %v2313_v54  ;;  %v2275_v34 = vld [vmem:[%s3108_s4 + $0x140] ss:$8 sps:$4 sm:$0xff]   ;;  %v2302_v54 = vld [vmem:[%s3108_s4 + $0x1d0] ss:$8 sps:$4 sm:$0xff]  }
  0x4b   :  { %706 = vmatprep.subr.bf16.mxu0 %v2239_v35 }
  0x4d   :  { %2114 = vmatpush3.bf16.msra.mxu1 %v2314_v55  ;;  %v111_v55 = vrot.slane %v2822_v4, %v110_v52  ;;  %v2325_v4 = vld [vmem:[%s3110_s6 + $0x78] sm:$0xff]  }
  0x4e   :  { %707 = vmatpush1.bf16.msra.mxu0 %v2241_v36  ;;  %2115 = vmatprep.subr.bf16.mxu1 %v2315_v56  ;;  %v2280_v36 = vld [vmem:[%s3108_s4 + $0x154] ss:$8 sps:$4 sm:$0xff]   ;;  %v2307_v56 = vld [vmem:[%s3108_s4 + $0x1e4] ss:$8 sps:$4 sm:$0xff]  }
  0x4f   :  { %708 = vmatprep.subr.bf16.mxu0 %v2242_v37  ;;  %v2278_v37 = vld [vmem:[%s3108_s4 + $0x150] ss:$8 sps:$4 sm:$0xff]  }
  0x51   :  { %2116 = vmatpush3.bf16.msra.mxu1 %v2316_v57  ;;  %v2305_v57 = vld [vmem:[%s3108_s4 + $0x1e0] ss:$8 sps:$4 sm:$0xff]  }
  0x52   :  { %709 = vmatpush1.bf16.msra.mxu0 %v2244_v38  ;;  %2117 = vmatprep.subr.bf16.mxu1 %v2317_v58  ;;  %v2283_v38 = vld [vmem:[%s3108_s4 + $0x164] ss:$8 sps:$4 sm:$0xff]  }
  0x53   :  { %710 = vmatprep.subr.bf16.mxu0 %v2245_v39  ;;  %v2281_v39 = vld [vmem:[%s3108_s4 + $0x160] ss:$8 sps:$4 sm:$0xff]  }
  0x55   :  { %2118 = vmatpush3.bf16.msra.mxu1 %v2318_v59  ;;  %v2310_v59 = vld [vmem:[%s3108_s4 + $0x1f4] ss:$8 sps:$4 sm:$0xff]  }
  0x56   :  { %711 = vmatpush1.bf16.msra.mxu0 %v2247_v40  ;;  %2119 = vmatprep.subr.bf16.mxu1 %v2319_v60  ;;  %v2286_v40 = vld [vmem:[%s3108_s4 + $0x174] ss:$8 sps:$4 sm:$0xff]   ;;  %v2308_v60 = vld [vmem:[%s3108_s4 + $0x1f0] ss:$8 sps:$4 sm:$0xff]  }
  0x57   :  { %712 = vmatprep.subr.bf16.mxu0 %v2248_v41  ;;  %v2284_v41 = vld [vmem:[%s3108_s4 + $0x170] ss:$8 sps:$4 sm:$0xff]  }
  0x59   :  { %2120 = vmatpush3.bf16.msra.mxu1 %v2320_v61 }
  0x5a   :  { %713 = vmatpush1.bf16.msra.mxu0 %v2250_v42  ;;  %2121 = vmatprep.subr.bf16.mxu1 %v2321_v62  ;;  %v2289_v42 = vld [vmem:[%s3108_s4 + $0x184] ss:$8 sps:$4 sm:$0xff]  }
  0x5b   :  { %714 = vmatprep.subr.bf16.mxu0 %v2251_v43  ;;  %v2287_v43 = vld [vmem:[%s3108_s4 + $0x180] ss:$8 sps:$4 sm:$0xff]  }
  0x5d   :  { %2122 = vmatpush3.bf16.msra.mxu1 %v2322_v63  ;;  %v2323_v63 = vld [vmem:[%s3110_s6 + $0x70] sm:$0xff]  }
  0x5e   :  { %715 = vmatpush1.bf16.msra.mxu0 %v2253_v44  ;;  %v2292_v44 = vld [vmem:[%s3108_s4 + $0x194] ss:$8 sps:$4 sm:$0xff]   ;;  %2123 = vmatprep.subr.bf16.mxu1 %v2323_v63  ;;  %v2366_v63 = vld [vmem:[#allocation5 + $0x180] ss:$16 sps:$4 sm:$0xff]  }
  0x5f   :  { %716 = vmatprep.subr.bf16.mxu0 %v2254_v45  ;;  %v2290_v45 = vld [vmem:[%s3108_s4 + $0x190] ss:$8 sps:$4 sm:$0xff]  }
  0x61   :  { %2124 = vmatpush3.bf16.msra.mxu1 %v2324_v1  ;;  %v2371_v1 = vld [vmem:[#allocation5 + $0x1a4] ss:$16 sps:$4 sm:$0xff]  }
  0x62   :  { %717 = vmatpush1.bf16.msra.mxu0 %v2256_v46  ;;  %v2295_v46 = vld [vmem:[%s3108_s4 + $0x1a4] ss:$8 sps:$4 sm:$0xff]   ;;  %2125 = vmatprep.subr.bf16.mxu1 %v2325_v4  ;;  %v2369_v4 = vld [vmem:[#allocation5 + $0x1a0] ss:$16 sps:$4 sm:$0xff]  }
  0x63   :  { %718 = vmatprep.subr.bf16.mxu0 %v2257_v47  ;;  %v2293_v47 = vld [vmem:[%s3108_s4 + $0x1a0] ss:$8 sps:$4 sm:$0xff]  }
  0x66   :  { %719 = vmatpush1.bf16.msra.mxu0 %v2259_v48  ;;  %v2298_v48 = vld [vmem:[%s3108_s4 + $0x1b4] ss:$8 sps:$4 sm:$0xff]  }
  0x67   :  { %720 = vmatprep.subr.bf16.mxu0 %v2260_v49  ;;  %v2296_v49 = vld [vmem:[%s3108_s4 + $0x1b0] ss:$8 sps:$4 sm:$0xff]  }
  0x6a   :  { %721 = vmatpush1.bf16.msra.mxu0 %v2262_v50  ;;  %v2301_v50 = vld [vmem:[%s3108_s4 + $0x1c4] ss:$8 sps:$4 sm:$0xff]  }
  0x6b   :  { %731 = vmatprep.subr.bf16.mxu0 %v2265_v51  ;;  %v2299_v51 = vld [vmem:[%s3108_s4 + $0x1c0] ss:$8 sps:$4 sm:$0xff]  }
 0x10b   :  { %v238_v8 = vpop.f32.mrb[0].mxu1 }
 0x10c   :  { %v239_v9 = vadd.f32 %v238_v8, %v103_v6  ;;  %v240_v10 = vpop.f32.mrb[1].mxu1  ;;  %v2326_v6 = vld [vmem:[%s3110_s6 + $0x38] sm:$0xff]  }
 0x10d   :  { %v241_v11 = vadd.f32 %v240_v10, %v107_v7  ;;  %v242_v12 = vpop.f32.mrb[2].mxu1  ;;  %2126 = vmatpush3.bf16.msra.mxu1 %v2326_v6  ;;  %v358_v7 = vld [vmem:[%s3109_s5] sm:$0x3]  ;;  %v2374_v6 = vld [vmem:[#allocation5 + $0x1c4] ss:$16 sps:$4 sm:$0xff]  }
 0x10e   :  { %v286_v13 = vmax.f32 %v239_v9, 0.0  ;;  %v243_v14 = vpop.f32.mrb[3].mxu1  ;;  %v363_v8 = vrot.slane %v358_v7, %v2817_v3  ;;  %v367_v9 = vrot.slane %v358_v7, %v2825_v5  ;;  %v2372_v7 = vld [vmem:[#allocation5 + $0x1c0] ss:$16 sps:$4 sm:$0xff]  }
 0x10f   :  { %v287_v15 = vmax.f32 %v241_v11, 0.0 }
 0x110   :  { %v290_v18 = vpack.c.bf16 %v286_v13, %v286_v13 }
 0x111   :  { %v291_v16 = vpack.c.bf16 %v287_v15, %v287_v15 }
 0x113   :  { %722 = vmatprep.mubr.bf16.mxu0 %v291_v16 }
 0x114   :  { %723 = vmatmul.mubr.bf16.vlgmr.msra.gmra.mrb[0].mxu0 %v290_v18 }
 0x115   :  { %732 = vmatpush1.bf16.msra.mxu0 %v2263_v17 }
 0x116   :  { %733 = vmatprep.subr.bf16.mxu0 %v2268_v19 }
 0x119   :  { %734 = vmatpush1.bf16.msra.mxu0 %v2266_v20  ;;  %v2327_v20 = vld [vmem:[%s3112_s8] ss:$8 sps:$4 sm:$0xff]  }
 0x11a   :  { %735 = vmatprep.subr.bf16.mxu0 %v2271_v22  ;;  %v2329_v22 = vld [vmem:[%s3112_s8 + $0x4] ss:$8 sps:$4 sm:$0xff]   ;;  %s2565_s8 = smov 112  }
 0x11b   :  { %v279_v26 = vpop.f32.mrb[4].mxu1  ;;  %990 = vmatprep.subr.bf16.mxu1 %v2329_v22  ;;  %v2436_v22 = vld [vmem:[%s3116_s12 + $0x68] sm:$0xff]  }
 0x11c   :  { %v281_v27 = vpop.f32.mrb[5].mxu1  ;;  %v280_v58 = vadd.f32 %v279_v26, %v111_v55  ;;  %v2354_v55 = vld [vmem:[#allocation5 + $0x100] ss:$16 sps:$4 sm:$0xff]  }
 0x11d   :  { %736 = vmatpush1.bf16.msra.mxu0 %v2269_v23  ;;  %v282_v29 = vadd.f32 %v281_v27, %v115_v24  ;;  %v283_v30 = vpop.f32.mrb[6].mxu1  ;;  %v1994_v24 = vld [vmem:[%s3111_s7] ss:$0 sm:$0xff] }
 0x11e   :  { %737 = vmatprep.subr.bf16.mxu0 %v2274_v25  ;;  %v284_v32 = vpop.f32.mrb[7].mxu1  ;;  %v288_v61 = vmax.f32 %v280_v58, 0.0  ;;  %v2362_v58 = vld [vmem:[#allocation5 + $0x144] ss:$16 sps:$4 sm:$0xff]  }
 0x11f   :  { %v289_v33 = vmax.f32 %v282_v29, 0.0 }
 0x120   :  { %v292_v62 = vpack.c.bf16 %v288_v61, %v288_v61  ;;  %v2363_v61 = vld [vmem:[#allocation5 + $0x160] ss:$16 sps:$4 sm:$0xff]  }
 0x121   :  { %738 = vmatpush1.bf16.msra.mxu0 %v2272_v28  ;;  %v293_v35 = vpack.c.bf16 %v289_v33, %v289_v33  ;;  %v954_v33 = vld [vmem:[%s3105_s1] sm:$0xff] }
 0x122   :  { %739 = vmatprep.subr.bf16.mxu0 %v2277_v31  ;;  %v2332_v31 = vld [vmem:[#allocation5 + $0x4] ss:$16 sps:$4 sm:$0xff]  }
 0x123   :  { %763 = vmatprep.mubr.bf16.mxu0 %v293_v35 }
 0x125   :  { %740 = vmatpush1.bf16.msra.mxu0 %v2275_v34 }
 0x126   :  { %741 = vmatprep.subr.bf16.mxu0 %v2280_v36 }
 0x129   :  { %742 = vmatpush1.bf16.msra.mxu0 %v2278_v37  ;;  %v2330_v37 = vld [vmem:[#allocation5] ss:$16 sps:$4 sm:$0xff]  }
 0x12a   :  { %743 = vmatprep.subr.bf16.mxu0 %v2283_v38 }
 0x12d   :  { %744 = vmatpush1.bf16.msra.mxu0 %v2281_v39  ;;  %v2335_v39 = vld [vmem:[#allocation5 + $0x24] ss:$16 sps:$4 sm:$0xff]  }
 0x12e   :  { %745 = vmatprep.subr.bf16.mxu0 %v2286_v40  ;;  %v2333_v40 = vld [vmem:[#allocation5 + $0x20] ss:$16 sps:$4 sm:$0xff]  }
 0x131   :  { %746 = vmatpush1.bf16.msra.mxu0 %v2284_v41  ;;  %v2338_v41 = vld [vmem:[#allocation5 + $0x44] ss:$16 sps:$4 sm:$0xff]  }
 0x132   :  { %747 = vmatprep.subr.bf16.mxu0 %v2289_v42  ;;  %v2336_v42 = vld [vmem:[#allocation5 + $0x40] ss:$16 sps:$4 sm:$0xff]  }
 0x135   :  { %748 = vmatpush1.bf16.msra.mxu0 %v2287_v43  ;;  %v2341_v43 = vld [vmem:[#allocation5 + $0x64] ss:$16 sps:$4 sm:$0xff]  }
 0x136   :  { %749 = vmatprep.subr.bf16.mxu0 %v2292_v44  ;;  %v2339_v44 = vld [vmem:[#allocation5 + $0x60] ss:$16 sps:$4 sm:$0xff]  }
 0x139   :  { %750 = vmatpush1.bf16.msra.mxu0 %v2290_v45  ;;  %v2344_v45 = vld [vmem:[#allocation5 + $0x84] ss:$16 sps:$4 sm:$0xff]  }
 0x13a   :  { %751 = vmatprep.subr.bf16.mxu0 %v2295_v46  ;;  %v2342_v46 = vld [vmem:[#allocation5 + $0x80] ss:$16 sps:$4 sm:$0xff]  }
 0x13d   :  { %752 = vmatpush1.bf16.msra.mxu0 %v2293_v47  ;;  %v2347_v47 = vld [vmem:[#allocation5 + $0xa4] ss:$16 sps:$4 sm:$0xff]  }
 0x13e   :  { %753 = vmatprep.subr.bf16.mxu0 %v2298_v48  ;;  %v2345_v48 = vld [vmem:[#allocation5 + $0xa0] ss:$16 sps:$4 sm:$0xff]  }
 0x141   :  { %754 = vmatpush1.bf16.msra.mxu0 %v2296_v49  ;;  %v2350_v49 = vld [vmem:[#allocation5 + $0xc4] ss:$16 sps:$4 sm:$0xff]  }
 0x142   :  { %755 = vmatprep.subr.bf16.mxu0 %v2301_v50  ;;  %v2348_v50 = vld [vmem:[#allocation5 + $0xc0] ss:$16 sps:$4 sm:$0xff]  }
 0x145   :  { %756 = vmatpush1.bf16.msra.mxu0 %v2299_v51  ;;  %v2353_v51 = vld [vmem:[#allocation5 + $0xe4] ss:$16 sps:$4 sm:$0xff]  }
 0x146   :  { %757 = vmatprep.subr.bf16.mxu0 %v2304_v53  ;;  %v2351_v53 = vld [vmem:[#allocation5 + $0xe0] ss:$16 sps:$4 sm:$0xff]  }
 0x149   :  { %758 = vmatpush1.bf16.msra.mxu0 %v2302_v54  ;;  %v2356_v54 = vld [vmem:[#allocation5 + $0x104] ss:$16 sps:$4 sm:$0xff]  }
 0x14a   :  { %759 = vmatprep.subr.bf16.mxu0 %v2307_v56  ;;  %v2359_v56 = vld [vmem:[#allocation5 + $0x124] ss:$16 sps:$4 sm:$0xff]  }
 0x14d   :  { %760 = vmatpush1.bf16.msra.mxu0 %v2305_v57  ;;  %v2357_v57 = vld [vmem:[#allocation5 + $0x120] ss:$16 sps:$4 sm:$0xff]  }
 0x14e   :  { %761 = vmatprep.subr.bf16.mxu0 %v2310_v59  ;;  %v2360_v59 = vld [vmem:[#allocation5 + $0x140] ss:$16 sps:$4 sm:$0xff]  }
 0x151   :  { %762 = vmatpush1.bf16.msra.mxu0 %v2308_v60  ;;  %v2365_v60 = vld [vmem:[#allocation5 + $0x164] ss:$16 sps:$4 sm:$0xff]  }
 0x154   :  { %764 = vmatmul.mubr.bf16.vlgmr.msra.gmra.mrb[0].mxu0 %v292_v62  ;;  %v2368_v62 = vld [vmem:[#allocation5 + $0x184] ss:$16 sps:$4 sm:$0xff]  }
 0x227   :  { %v765_v10 = vpop.f32.mrb[0].mxu0 }
 0x228   :  { %v2177_v11 = vadd.f32 %v765_v10, %v363_v8  ;;  %v767_v12 = vpop.f32.mrb[1].mxu0  ;;  %v2377_v8 = vld [vmem:[#allocation5 + $0x1e4] ss:$16 sps:$4 sm:$0xff]   ;;  %v2380_v10 = vld [vmem:[#allocation5 + $0xc] ss:$16 sps:$4 sm:$0xff]  }
 0x229   :  { %v2178_v13 = vadd.f32 %v767_v12, %v367_v9  ;;  %v769_v14 = vpop.f32.mrb[2].mxu0  ;;  %v2375_v9 = vld [vmem:[#allocation5 + $0x1e0] ss:$16 sps:$4 sm:$0xff]  }
 0x22a   :  { %v772_v15 = vmax.f32 %v2177_v11, 0.0  ;;  %v770_v16 = vpop.f32.mrb[3].mxu0  ;;  %v2426_v11 = vld [vmem:[%s3116_s12 + $0x40] sm:$0xff]   ;;  %v2429_v14 = vld [vmem:[%s3116_s12 + $0x8] sm:$0xff]  }
 0x22b   :  { %v773_v17 = vmax.f32 %v2178_v13, 0.0  ;;  %v2427_v12 = vld [vmem:[%s3116_s12] sm:$0xff]   ;;  %v2428_v13 = vld [vmem:[%s3116_s12 + $0x48] sm:$0xff]   ;;  %2133 = vmatprep.subr.bf16.mxu0 %v2426_v11  ;;  %v2431_v16 = vld [vmem:[%s3116_s12 + $0x10] sm:$0xff]  }
 0x22c   :  { %v774_v19 = vpack.c.bf16 %v772_v15, %v772_v15  ;;  %2134 = vmatpush3.bf16.msra.mxu0 %v2427_v12  ;;  %v2430_v15 = vld [vmem:[%s3116_s12 + $0x50] sm:$0xff]   ;;  %v2441_v11 = vld [vmem:[%s3116_s12 + $0x38] sm:$0xff]   ;;  %v2442_v12 = vld [vmem:[%s3116_s12 + $0xc0] sm:$0xff]  }
 0x22d   :  { %v775_v18 = vpack.c.bf16 %v773_v17, %v773_v17  ;;  %2135 = vmatprep.subr.bf16.mxu0 %v2428_v13  ;;  %v2432_v17 = vld [vmem:[%s3116_s12 + $0x58] sm:$0xff]   ;;  %v1099_v13 = vld [vmem:[%s3115_s11] sm:$0xf] }
 0x22f   :  { %943 = vmatprep.mubr.bf16.mxu1 %v775_v18  ;;  %v2433_v18 = vld [vmem:[%s3116_s12 + $0x18] sm:$0xff]  }
 0x230   :  { %944 = vmatmul.mubr.bf16.vlgmr.msra.gmra.mrb[8].mxu1 %v774_v19  ;;  %2136 = vmatpush3.bf16.msra.mxu0 %v2429_v14  ;;  %v2434_v19 = vld [vmem:[%s3116_s12 + $0x60] sm:$0xff]   ;;  %v1104_v14 = vrot.slane %v1099_v13, %v2817_v3 }
 0x231   :  { %1022 = vmatprep.mubr.bf16.mxu1 %v2564_v0  ;;  %991 = vmatpush1.bf16.msra.mxu1 %v2327_v20  ;;  %v2435_v20 = vld [vmem:[%s3116_s12 + $0x20] sm:$0xff]  }
 0x232   :  { %1441 = vmatprep.subr.bf16.mxu1 %v2332_v31  ;;  %2137 = vmatprep.subr.bf16.mxu0 %v2430_v15  ;;  %v1108_v15 = vrot.slane %v1099_v13, %v2825_v5 }
 0x234   :  { %2138 = vmatpush3.bf16.msra.mxu0 %v2431_v16 }
 0x235   :  { %2139 = vmatprep.subr.bf16.mxu0 %v2432_v17 }
 0x238   :  { %2140 = vmatpush3.bf16.msra.mxu0 %v2433_v18 }
 0x239   :  { %2141 = vmatprep.subr.bf16.mxu0 %v2434_v19 }
 0x23c   :  { %2142 = vmatpush3.bf16.msra.mxu0 %v2435_v20 }
 0x23d   :  { %2143 = vmatprep.subr.bf16.mxu0 %v2436_v22 }
 0x303   :  { %v2127_v23 = vpop.f32.mrb[8].mxu1 }
 0x304   :  { %v2128_v25 = vpop.f32.mrb[9].mxu1 }
 0x305   :  { %v2129_v26 = vadd.f32 %v2128_v25, %v2127_v23  ;;  %v2130_v27 = vpop.f32.mrb[10].mxu1  ;;  %v2437_v23 = vld [vmem:[%s3116_s12 + $0x28] sm:$0xff]  }
 0x306   :  { %v2131_v28 = vpop.f32.mrb[11].mxu1  ;;  %2144 = vmatpush3.bf16.msra.mxu0 %v2437_v23 }
 0x307   :  { %v946_v0 = vadd.f32 %v2129_v26, %v1994_v24  ;;  %v964_v24 = vld [vmem:[%s3113_s9] sm:$0x3] }
 0x308   :  { %v969_v25 = vrot.slane %v964_v24, %v2817_v3  ;;  %v973_v26 = vrot.slane %v964_v24, %v2825_v5  ;;  %v2444_v3 = vld [vmem:[%s3116_s12 + $0xc8] sm:$0xff]  }
 0x309   :  { %v951_v29 = vmul.f32 0.5, %v946_v0  ;;  %1881 = vst.msk [vmem:[#allocation8] sm:$0xff] %vm1880_vm1, %v946_v0  ;;  %v2445_v5 = vld [vmem:[%s3116_s12 + $0x88] sm:$0xff]  }
 0x30b   :  { %v952_v30 = vmul.f32 1.442695, %v951_v29 }
 0x30d   :  { %2458 = vpow2.f32 %v952_v30 }
 0x317   :  { %v2459_v32 = vpop.eup %2458 }
 0x318   :  { %956 = vrot.lane.b32.xlu0 %v2459_v32, %s2565_s8 }
 0x38a   :  { %v957_v34 = vpop.permute.xlu0 %956 }
 0x38b   :  { %v959_v35 = vmul.f32 %v957_v34, %v954_v33 }
 0x38d   :  { %v960_v36 = vadd.f32 %v959_v35, %v946_v0  ;;  %v2378_v35 = vld [vmem:[#allocation5 + $0x8] ss:$16 sps:$4 sm:$0xff]  }
 0x38f   :  { %v961_v38 = vpack.c.bf16 %v960_v36, %v960_v36 }
 0x391   :  { %2013 = vmatmul.mubr.msk.bf16.vlgmr.msra.gmra.mrb[12].mxu1 %vm986_vm2, %v961_v38  ;;  %v2381_v38 = vld [vmem:[#allocation5 + $0x28] ss:$16 sps:$4 sm:$0xff]  }
 0x392   :  { %1442 = vmatpush1.bf16.msra.mxu1 %v2330_v37  ;;  %v2383_v37 = vld [vmem:[#allocation5 + $0x2c] ss:$16 sps:$4 sm:$0xff]  }
 0x393   :  { %1443 = vmatprep.subr.bf16.mxu1 %v2335_v39  ;;  %v2386_v39 = vld [vmem:[#allocation5 + $0x4c] ss:$16 sps:$4 sm:$0xff]  }
 0x396   :  { %1444 = vmatpush1.bf16.msra.mxu1 %v2333_v40  ;;  %v2384_v40 = vld [vmem:[#allocation5 + $0x48] ss:$16 sps:$4 sm:$0xff]  }
 0x397   :  { %1445 = vmatprep.subr.bf16.mxu1 %v2338_v41  ;;  %v2389_v41 = vld [vmem:[#allocation5 + $0x6c] ss:$16 sps:$4 sm:$0xff]  }
 0x39a   :  { %1446 = vmatpush1.bf16.msra.mxu1 %v2336_v42  ;;  %v2387_v42 = vld [vmem:[#allocation5 + $0x68] ss:$16 sps:$4 sm:$0xff]  }
 0x39b   :  { %1447 = vmatprep.subr.bf16.mxu1 %v2341_v43  ;;  %v2392_v43 = vld [vmem:[#allocation5 + $0x8c] ss:$16 sps:$4 sm:$0xff]  }
 0x39e   :  { %1448 = vmatpush1.bf16.msra.mxu1 %v2339_v44  ;;  %v2390_v44 = vld [vmem:[#allocation5 + $0x88] ss:$16 sps:$4 sm:$0xff]  }
 0x39f   :  { %1449 = vmatprep.subr.bf16.mxu1 %v2344_v45  ;;  %v2395_v45 = vld [vmem:[#allocation5 + $0xac] ss:$16 sps:$4 sm:$0xff]  }
 0x3a2   :  { %1450 = vmatpush1.bf16.msra.mxu1 %v2342_v46  ;;  %v2393_v46 = vld [vmem:[#allocation5 + $0xa8] ss:$16 sps:$4 sm:$0xff]  }
 0x3a3   :  { %1451 = vmatprep.subr.bf16.mxu1 %v2347_v47  ;;  %v2398_v47 = vld [vmem:[#allocation5 + $0xcc] ss:$16 sps:$4 sm:$0xff]  }
 0x3a6   :  { %1452 = vmatpush1.bf16.msra.mxu1 %v2345_v48  ;;  %v2396_v48 = vld [vmem:[#allocation5 + $0xc8] ss:$16 sps:$4 sm:$0xff]  }
 0x3a7   :  { %1453 = vmatprep.subr.bf16.mxu1 %v2350_v49  ;;  %v2401_v49 = vld [vmem:[#allocation5 + $0xec] ss:$16 sps:$4 sm:$0xff]  }
 0x3aa   :  { %1454 = vmatpush1.bf16.msra.mxu1 %v2348_v50  ;;  %v2399_v50 = vld [vmem:[#allocation5 + $0xe8] ss:$16 sps:$4 sm:$0xff]  }
 0x3ab   :  { %1455 = vmatprep.subr.bf16.mxu1 %v2353_v51  ;;  %v2404_v51 = vld [vmem:[#allocation5 + $0x10c] ss:$16 sps:$4 sm:$0xff]  }
 0x3ae   :  { %1456 = vmatpush1.bf16.msra.mxu1 %v2351_v53  ;;  %v2402_v53 = vld [vmem:[#allocation5 + $0x108] ss:$16 sps:$4 sm:$0xff]  }
 0x3af   :  { %1457 = vmatprep.subr.bf16.mxu1 %v2356_v54  ;;  %v2407_v54 = vld [vmem:[#allocation5 + $0x12c] ss:$16 sps:$4 sm:$0xff]  }
 0x3b2   :  { %1458 = vmatpush1.bf16.msra.mxu1 %v2354_v55  ;;  %v2405_v55 = vld [vmem:[#allocation5 + $0x128] ss:$16 sps:$4 sm:$0xff]  }
 0x3b3   :  { %1459 = vmatprep.subr.bf16.mxu1 %v2359_v56  ;;  %v2410_v56 = vld [vmem:[#allocation5 + $0x14c] ss:$16 sps:$4 sm:$0xff]  }
 0x3b6   :  { %1460 = vmatpush1.bf16.msra.mxu1 %v2357_v57  ;;  %v2408_v57 = vld [vmem:[#allocation5 + $0x148] ss:$16 sps:$4 sm:$0xff]  }
 0x3b7   :  { %1461 = vmatprep.subr.bf16.mxu1 %v2362_v58  ;;  %v2413_v58 = vld [vmem:[#allocation5 + $0x16c] ss:$16 sps:$4 sm:$0xff]  }
 0x3ba   :  { %1462 = vmatpush1.bf16.msra.mxu1 %v2360_v59  ;;  %v2411_v59 = vld [vmem:[#allocation5 + $0x168] ss:$16 sps:$4 sm:$0xff]  }
 0x3bb   :  { %1463 = vmatprep.subr.bf16.mxu1 %v2365_v60  ;;  %v2416_v60 = vld [vmem:[#allocation5 + $0x18c] ss:$16 sps:$4 sm:$0xff]  }
 0x3be   :  { %1464 = vmatpush1.bf16.msra.mxu1 %v2363_v61  ;;  %v2414_v61 = vld [vmem:[#allocation5 + $0x188] ss:$16 sps:$4 sm:$0xff]  }
 0x3bf   :  { %1465 = vmatprep.subr.bf16.mxu1 %v2368_v62  ;;  %v2419_v62 = vld [vmem:[#allocation5 + $0x1ac] ss:$16 sps:$4 sm:$0xff]  }
 0x3c2   :  { %1466 = vmatpush1.bf16.msra.mxu1 %v2366_v63  ;;  %v2417_v63 = vld [vmem:[#allocation5 + $0x1a8] ss:$16 sps:$4 sm:$0xff]  }
 0x3c3   :  { %1467 = vmatprep.subr.bf16.mxu1 %v2371_v1  ;;  %v2422_v1 = vld [vmem:[#allocation5 + $0x1cc] ss:$16 sps:$4 sm:$0xff]  }
 0x3c6   :  { %1468 = vmatpush1.bf16.msra.mxu1 %v2369_v4  ;;  %v2420_v4 = vld [vmem:[#allocation5 + $0x1c8] ss:$16 sps:$4 sm:$0xff]  }
 0x3c7   :  { %1469 = vmatprep.subr.bf16.mxu1 %v2374_v6  ;;  %v2425_v6 = vld [vmem:[#allocation5 + $0x1ec] ss:$16 sps:$4 sm:$0xff]  }
 0x3ca   :  { %1470 = vmatpush1.bf16.msra.mxu1 %v2372_v7  ;;  %v2423_v7 = vld [vmem:[#allocation5 + $0x1e8] ss:$16 sps:$4 sm:$0xff]  }
 0x3cb   :  { %1471 = vmatprep.subr.bf16.mxu1 %v2377_v8  ;;  %v2438_v8 = vld [vmem:[%s3116_s12 + $0x70] sm:$0xff]  }
 0x3cc   :  { %2145 = vmatprep.subr.bf16.mxu0 %v2438_v8 }
 0x3ce   :  { %1472 = vmatpush1.bf16.msra.mxu1 %v2375_v9  ;;  %v2439_v9 = vld [vmem:[%s3116_s12 + $0x30] sm:$0xff]  }
 0x3cf   :  { %1482 = vmatprep.subr.bf16.mxu1 %v2380_v10  ;;  %2146 = vmatpush3.bf16.msra.mxu0 %v2439_v9  ;;  %v2440_v10 = vld [vmem:[%s3116_s12 + $0x78] sm:$0xff]  }
 0x3d0   :  { %2147 = vmatprep.subr.bf16.mxu0 %v2440_v10 }
 0x3d3   :  { %2148 = vmatpush3.bf16.msra.mxu0 %v2441_v11 }
 0x3d4   :  { %2155 = vmatprep.subr.bf16.mxu0 %v2442_v12 }
 0x464   :  { %v1024_v27 = vpop.f32.mrb[12].mxu1 }
 0x465   :  { %v1025_v28 = vadd.f32 %v1024_v27, %v969_v25  ;;  %v1026_v0 = vpop.f32.mrb[13].mxu1 }
 0x466   :  { %v1027_v29 = vadd.f32 %v1026_v0, %v973_v26  ;;  %v1028_v30 = vpop.f32.mrb[14].mxu1  ;;  %v2443_v26 = vld [vmem:[%s3116_s12 + $0x80] sm:$0xff]   ;;  %v2447_v0 = vld [vmem:[%s3116_s12 + $0x90] sm:$0xff]  }
 0x467   :  { %v1031_v31 = vmax.f32 %v1025_v28, 0.0  ;;  %v1029_v32 = vpop.f32.mrb[15].mxu1  ;;  %v2446_v28 = vld [vmem:[%s3116_s12 + $0xd0] sm:$0xff]   ;;  %v2449_v30 = vld [vmem:[%s3116_s12 + $0x98] sm:$0xff]  }
 0x468   :  { %v1032_v33 = vmax.f32 %v1027_v29, 0.0  ;;  %v2448_v29 = vld [vmem:[%s3116_s12 + $0xd8] sm:$0xff]   ;;  %v2451_v32 = vld [vmem:[%s3116_s12 + $0xa0] sm:$0xff]  }
 0x469   :  { %v3003_v36 = vpack.c.bf16 %v1031_v31, %v1031_v31  ;;  %v2450_v31 = vld [vmem:[%s3116_s12 + $0xe0] sm:$0xff]  }
 0x46a   :  { %v1034_v34 = vpack.c.bf16 %v1032_v33, %v1032_v33  ;;  %v2452_v33 = vld [vmem:[%s3116_s12 + $0xe8] sm:$0xff]  }
 0x46c   :  { %1473 = vmatprep.mubr.bf16.mxu1 %v1034_v34 }
 0x46d   :  { %1474 = vmatmul.mubr.bf16.vlgmr.msra.gmra.mrb[16].mxu1 %v3003_v36 }
 0x46e   :  { %1483 = vmatpush1.bf16.msra.mxu1 %v2378_v35  ;;  %1514 = vmatprep.mubr.bf16.mxu1 %v1034_v34  ;;  %v2453_v34 = vld [vmem:[%s3116_s12 + $0xa8] sm:$0xff]   ;;  %v2454_v35 = vld [vmem:[%s3116_s12 + $0xf0] sm:$0xff]  }
 0x46f   :  { %1484 = vmatprep.subr.bf16.mxu1 %v2383_v37  ;;  %v2456_v37 = vld [vmem:[%s3116_s12 + $0xf8] sm:$0xff]  }
 0x472   :  { %1485 = vmatpush1.bf16.msra.mxu1 %v2381_v38  ;;  %v2457_v38 = vld [vmem:[%s3116_s12 + $0xb8] sm:$0xff]  }
 0x473   :  { %1486 = vmatprep.subr.bf16.mxu1 %v2386_v39  ;;  %v1112_v39 = vrot.slane %v1099_v13, %v110_v52 }
 0x476   :  { %1487 = vmatpush1.bf16.msra.mxu1 %v2384_v40  ;;  %v1116_v40 = vrot.slane %v1099_v13, %v114_v21 }
 0x477   :  { %1488 = vmatprep.subr.bf16.mxu1 %v2389_v41 }
 0x47a   :  { %1489 = vmatpush1.bf16.msra.mxu1 %v2387_v42 }
 0x47b   :  { %1490 = vmatprep.subr.bf16.mxu1 %v2392_v43 }
 0x47e   :  { %1491 = vmatpush1.bf16.msra.mxu1 %v2390_v44 }
 0x47f   :  { %1492 = vmatprep.subr.bf16.mxu1 %v2395_v45 }
 0x482   :  { %1493 = vmatpush1.bf16.msra.mxu1 %v2393_v46 }
 0x483   :  { %1494 = vmatprep.subr.bf16.mxu1 %v2398_v47 }
 0x486   :  { %1495 = vmatpush1.bf16.msra.mxu1 %v2396_v48 }
 0x487   :  { %1496 = vmatprep.subr.bf16.mxu1 %v2401_v49 }
 0x48a   :  { %1497 = vmatpush1.bf16.msra.mxu1 %v2399_v50 }
 0x48b   :  { %1498 = vmatprep.subr.bf16.mxu1 %v2404_v51 }
 0x48e   :  { %1499 = vmatpush1.bf16.msra.mxu1 %v2402_v53 }
 0x48f   :  { %1500 = vmatprep.subr.bf16.mxu1 %v2407_v54 }
 0x492   :  { %1501 = vmatpush1.bf16.msra.mxu1 %v2405_v55 }
 0x493   :  { %1502 = vmatprep.subr.bf16.mxu1 %v2410_v56 }
 0x496   :  { %1503 = vmatpush1.bf16.msra.mxu1 %v2408_v57 }
 0x497   :  { %1504 = vmatprep.subr.bf16.mxu1 %v2413_v58 }
 0x49a   :  { %1505 = vmatpush1.bf16.msra.mxu1 %v2411_v59 }
 0x49b   :  { %1506 = vmatprep.subr.bf16.mxu1 %v2416_v60 }
 0x49e   :  { %1507 = vmatpush1.bf16.msra.mxu1 %v2414_v61 }
 0x49f   :  { %1508 = vmatprep.subr.bf16.mxu1 %v2419_v62 }
 0x4a2   :  { %1509 = vmatpush1.bf16.msra.mxu1 %v2417_v63 }
 0x4a3   :  { %1510 = vmatprep.subr.bf16.mxu1 %v2422_v1 }
 0x4a6   :  { %1511 = vmatpush1.bf16.msra.mxu1 %v2420_v4 }
 0x4a7   :  { %1512 = vmatprep.subr.bf16.mxu1 %v2425_v6 }
 0x4aa   :  { %1513 = vmatpush1.bf16.msra.mxu1 %v2423_v7 }
 0x4ad   :  { %1515 = vmatmul.mubr.bf16.vlgmr.msra.gmra.mrb[20].mxu1 %v3003_v36  ;;  %v2455_v36 = vld [vmem:[%s3116_s12 + $0xb0] sm:$0xff]   ;;  %s2566_s12 = smov [#allocation8]  }
 0x4ae   :  { %s1898_s11 = sshll.u32 %s2566_s12, 4  ;;  %s1899_s11 = int_to_ptr.vmem [resolvable:$true] %s1898_s11 }
 0x4af   :  { %s2508_s2 = scalar_lea.vmem %s1899_s11, 128  ;;  %p2513_p3 = scmp.lt.s32.totalorder %s1899_s11, %s1899_s11 }
 0x4b0   :  { %p2509_p2 = scmp.ne.s32.totalorder %s1899_s11, %s2508_s2  ;;  %p2514_p4 = scmp.lt.s32.totalorder %s2508_s2, %s2508_s2 }
 0x4b2   :  { %p2515_p5 = por %p2514_p4, %p2513_p3 }
 0x4b4   :  { %p2516_p6 = pnand %p2515_p5, %p2509_p2 }
 0x540   :  { %v1475_v16 = vpop.f32.mrb[16].mxu1 }
 0x541   :  { %v1476_v17 = vadd.f32 %v1475_v16, %v1104_v14  ;;  %v1477_v18 = vpop.f32.mrb[17].mxu1 }
 0x542   :  { %v1478_v19 = vadd.f32 %v1477_v18, %v1108_v15  ;;  %v1479_v20 = vpop.f32.mrb[18].mxu1 }
 0x543   :  { %v1523_v22 = vmax.f32 %v1476_v17, 0.0  ;;  %v1480_v23 = vpop.f32.mrb[19].mxu1 }
 0x544   :  { %v1524_v24 = vmax.f32 %v1478_v19, 0.0 }
 0x545   :  { %v1527_v27 = vpack.c.bf16 %v1523_v22, %v1523_v22 }
 0x546   :  { %v1528_v25 = vpack.c.bf16 %v1524_v24, %v1524_v24 }
 0x548   :  { %1826 = vmatprep.mubr.bf16.mxu0 %v1528_v25 }
 0x549   :  { %1827 = vmatmul.mubr.bf16.vlgmr.msra.gmra.mrb[4].mxu0 %v1527_v27 }
 0x54a   :  { %2156 = vmatpush3.bf16.msra.mxu0 %v2443_v26 }
 0x54b   :  { %2157 = vmatprep.subr.bf16.mxu0 %v2444_v3 }
 0x54e   :  { %2158 = vmatpush3.bf16.msra.mxu0 %v2445_v5 }
 0x54f   :  { %2159 = vmatprep.subr.bf16.mxu0 %v2446_v28 }
 0x552   :  { %2160 = vmatpush3.bf16.msra.mxu0 %v2447_v0 }
 0x553   :  { %2161 = vmatprep.subr.bf16.mxu0 %v2448_v29 }
 0x556   :  { %2162 = vmatpush3.bf16.msra.mxu0 %v2449_v30 }
 0x557   :  { %2163 = vmatprep.subr.bf16.mxu0 %v2450_v31 }
 0x55a   :  { %2164 = vmatpush3.bf16.msra.mxu0 %v2451_v32 }
 0x55b   :  { %2165 = vmatprep.subr.bf16.mxu0 %v2452_v33 }
 0x55e   :  { %2166 = vmatpush3.bf16.msra.mxu0 %v2453_v34 }
 0x55f   :  { %2167 = vmatprep.subr.bf16.mxu0 %v2454_v35 }
 0x562   :  { %2168 = vmatpush3.bf16.msra.mxu0 %v2455_v36 }
 0x563   :  { %2169 = vmatprep.subr.bf16.mxu0 %v2456_v37 }
 0x566   :  { %2170 = vmatpush3.bf16.msra.mxu0 %v2457_v38 }
 0x580   :  { %v1516_v41 = vpop.f32.mrb[20].mxu1 }
 0x581   :  { %v1517_v42 = vadd.f32 %v1516_v41, %v1112_v39  ;;  %v1518_v43 = vpop.f32.mrb[21].mxu1 }
 0x582   :  { %v1519_v44 = vadd.f32 %v1518_v43, %v1116_v40  ;;  %v1520_v45 = vpop.f32.mrb[22].mxu1 }
 0x583   :  { %v1525_v46 = vmax.f32 %v1517_v42, 0.0  ;;  %v1521_v47 = vpop.f32.mrb[23].mxu1 }
 0x584   :  { %v1526_v48 = vmax.f32 %v1519_v44, 0.0 }
 0x585   :  { %v1529_v50 = vpack.c.bf16 %v1525_v46, %v1525_v46 }
 0x586   :  { %v1530_v49 = vpack.c.bf16 %v1526_v48, %v1526_v48 }
 0x588   :  { %1866 = vmatprep.mubr.bf16.mxu0 %v1530_v49 }
 0x589   :  { %1867 = vmatmul.mubr.bf16.vlgmr.msra.gmra.mrb[8].mxu0 %v1529_v50 }
 0x58a   :  { %2519 = shalt.err (!%p2516_p6)
}
 0x58b   :  { %s2520_s19 = scalar_lea.hbm %s3119_s15, 128 }
 0x58c   :  { %p2521_p7 = scmp.ne.s32.totalorder %s3119_s15, %s2520_s19  ;;  %p2524_p8 = scmp.lt.u32.totalorder %s2520_s19, %s3119_s15 }
 0x58e   :  { %p2526_p9 = pnand %p2524_p8, %p2521_p7 }
 0x590   :  { %2529 = shalt.err (!%p2526_p9)
}
 0x591   :  { %1901 = dma.vmem_to_hbm [thread:$0]  %s1899_s11, 128, %s3119_s15, [#allocation9]   ;;  %v2078_v54 = vld [vmem:[%s3117_s13] ss:$0 sm:$0xff] }
 0x592   :  { %s2567_s15 = smov [#allocation7]  }
 0x593   :  { %s1888_s7 = sshll.u32 %s2567_s15, 4  ;;  %s1889_s7 = int_to_ptr.vmem [resolvable:$true] %s1888_s7 }
 0x594   :  { %s2530_s13 = scalar_lea.vmem %s1889_s7, 128  ;;  %p2535_p11 = scmp.lt.s32.totalorder %s1889_s7, %s1889_s7 }
 0x595   :  { %p2531_p10 = scmp.ne.s32.totalorder %s1889_s7, %s2530_s13  ;;  %p2536_p12 = scmp.lt.s32.totalorder %s2530_s13, %s2530_s13 }
 0x597   :  { %p2537_p13 = por %p2536_p12, %p2535_p11 }
 0x599   :  { %p2538_p0 = pnand %p2537_p13, %p2531_p10 }
 0x61c   :  { %v2149_v2 = vpop.f32.mrb[4].mxu0 }
 0x61d   :  { %v2150_v21 = vpop.f32.mrb[5].mxu0 }
 0x61e   :  { %v2151_v52 = vadd.f32 %v2150_v21, %v2149_v2  ;;  %v2152_v51 = vpop.f32.mrb[6].mxu0 }
 0x61f   :  { %v2153_v53 = vpop.f32.mrb[7].mxu0 }
 0x620   :  { %v1829_v57 = vadd.f32 %v2151_v52, %v2078_v54 }
 0x65c   :  { %v2171_v55 = vpop.f32.mrb[8].mxu0 }
 0x65d   :  { %v2172_v56 = vpop.f32.mrb[9].mxu0 }
 0x65e   :  { %v2173_v58 = vadd.f32 %v2172_v56, %v2171_v55  ;;  %v2174_v59 = vpop.f32.mrb[10].mxu0 }
 0x65f   :  { %v2175_v60 = vpop.f32.mrb[11].mxu0 }
 0x660   :  { %v1869_v61 = vadd.f32 %v2173_v58, %v1829_v57 }
 0x662   :  { %v1874_v62 = vsub.f32 0.0, %v1869_v61 }
 0x664   :  { %v1875_v63 = vmul.f32 1.442695, %v1874_v62 }
 0x666   :  { %2460 = vpow2.f32 %v1875_v63 }
 0x670   :  { %v2461_v1 = vpop.eup %2460 }
 0x671   :  { %v1877_v4 = vadd.f32 1.0, %v2461_v1 }
 0x673   :  { %2462 = vrcp.f32 %v1877_v4 }
 0x67d   :  { %v2463_v6 = vpop.eup %2462 }
 0x67e   :  { %1879 = vst.msk [vmem:[#allocation7] sm:$0xff] %vm200_vm0, %v2463_v6 }
 0x67f   :  { %2541 = shalt.err (!%p2538_p0)
}
 0x680   :  { %s2542_s18 = scalar_lea.hbm %s3118_s14, 128 }
 0x681   :  { %p2543_p1 = scmp.ne.s32.totalorder %s3118_s14, %s2542_s18  ;;  %p2546_p2 = scmp.lt.u32.totalorder %s2542_s18, %s3118_s14 }
 0x683   :  { %p2548_p3 = pnand %p2546_p2, %p2543_p1 }
 0x685   :  { %2551 = shalt.err (!%p2548_p3)
}
 0x686   :  { %1891 = dma.vmem_to_hbm [thread:$0]  %s1889_s7, 128, %s3118_s14, [#allocation4]  }
 0x687   :  { %2556 = dma.done.wait [#allocation4], 128  }
 0x688   :  { %2557 = vsyncadd [#allocation4], 4294967168 }
 0x689   :  { %2558 = dma.done.wait [#allocation9], 128  }
 0x68a   :  { %2559 = vsyncadd [#allocation9], 4294967168 }
 0x68b   :  { %1908 = vsyncpa [#allocation3], 1 }
 0x68c   :  { %1909 = vsyncpa [#allocation6], 1 }
 0x68d   :  { %1910 = vsyncpa [#allocation4], 1 }
 0x68e   :  { %1911 = vsyncpa [#allocation9], 1 }

</bundles_post_ra>
